<compile_context>
chip_gen: v7x
topology: tpu7x:2x2x1
jax: 0.10.0
libtpu: 0.0.40
codegen_flags: <defaults>
</compile_context>

<pallas_src>
import jax
import jax.numpy as jnp
from jax.experimental import pallas as pl
from jax.experimental.pallas import tpu as pltpu

INPUT_DIM = 51
OUTPUT_DIM = 3
HIDDEN = (64, 32, 16)

K_PAD = 64     # input features padded 51 -> 64 (sublane-clean first matmul)
N_PAD = 128    # last layer padded 3 -> 128 lanes (unmasked, lane-dense stores)


def mlp_kernel(x_ref, w1_ref, b1_ref, w2_ref, b2_ref, w3_ref, b3_ref,
               w4_ref, b4_ref, o_ref):
    # One batch tile per grid step; weights stay resident in VMEM across steps.
    h = jnp.dot(x_ref[...], w1_ref[...], preferred_element_type=jnp.float32)
    h = jnp.maximum(h + b1_ref[...], 0.0).astype(jnp.bfloat16)            # [TB, 64]

    h = jnp.dot(h, w2_ref[...], preferred_element_type=jnp.float32)
    h = jnp.maximum(h + b2_ref[...], 0.0).astype(jnp.bfloat16)            # [TB, 32]

    h = jnp.dot(h, w3_ref[...], preferred_element_type=jnp.float32)
    h = jnp.maximum(h + b3_ref[...], 0.0).astype(jnp.bfloat16)            # [TB, 16]

    # Padded logits: w4 columns >= OUTPUT_DIM are exactly zero and b4 is -inf
    # there, so padded lanes contribute exp(-inf) = 0 to the softmax sum and
    # never win the row max.
    logits = jnp.dot(h, w4_ref[...], preferred_element_type=jnp.float32) + b4_ref[...]
    m = jnp.max(logits, axis=1, keepdims=True)
    e = jnp.exp(logits - m)
    denom = jnp.sum(e, axis=1, keepdims=True)
    o_ref[...] = (e * pl.reciprocal(denom, approx=True)).astype(o_ref.dtype)


def _round_up(n, m):
    return (n + m - 1) // m * m


def nn_forward(x, params, *, tile_b=2048):
    """x: [B, INPUT_DIM] f32; params: list of (W [in,out] f32, b [1,out] f32)."""
    (w1, b1), (w2, b2), (w3, b3), (w4, b4) = params
    B = x.shape[0]

    tb = min(tile_b, _round_up(max(B, 1), 8))   # batch tile, multiple of 8 sublanes
    b_pad = _round_up(B, tb)

    # Pad / cast: bf16 matmul operands, f32 biases (and f32 accumulation in-kernel).
    xp = jnp.pad(x, ((0, b_pad - B), (0, K_PAD - INPUT_DIM))).astype(jnp.bfloat16)
    w1p = jnp.pad(w1, ((0, K_PAD - INPUT_DIM), (0, 0))).astype(jnp.bfloat16)
    w2b = w2.astype(jnp.bfloat16)
    w3b = w3.astype(jnp.bfloat16)
    w4p = jnp.pad(w4, ((0, 0), (0, N_PAD - OUTPUT_DIM))).astype(jnp.bfloat16)
    b4p = jnp.pad(b4, ((0, 0), (0, N_PAD - OUTPUT_DIM)),
                  constant_values=-jnp.inf).astype(jnp.float32)

    def resident(arr):  # full-array block, same block every grid step
        return pl.BlockSpec(arr.shape, lambda i: (0, 0))

    out = pl.pallas_call(
        mlp_kernel,
        out_shape=jax.ShapeDtypeStruct((b_pad, N_PAD), jnp.float32),
        grid=(b_pad // tb,),
        in_specs=[
            pl.BlockSpec((tb, K_PAD), lambda i: (i, 0)),   # x streams through VMEM
            resident(w1p), resident(b1),
            resident(w2b), resident(b2),
            resident(w3b), resident(b3),
            resident(w4p), resident(b4p),
        ],
        out_specs=pl.BlockSpec((tb, N_PAD), lambda i: (i, 0)),
        compiler_params=pltpu.CompilerParams(
            dimension_semantics=("parallel",)),            # megacore on v7x
    )(xp, w1p, b1, w2b, b2, w3b, b3, w4p, b4p)

    return out[:B, :OUTPUT_DIM]


def init_params(key):
    """Deterministic init mimicking torch.nn.Linear default (uniform +/- 1/sqrt(fan_in))."""
    dims = (INPUT_DIM,) + HIDDEN + (OUTPUT_DIM,)
    params = []
    for i in range(len(dims) - 1):
        fan_in, fan_out = dims[i], dims[i + 1]
        key, kw, kb = jax.random.split(key, 3)
        bound = 1.0 / (fan_in ** 0.5)
        w = jax.random.uniform(kw, (fan_in, fan_out), jnp.float32, -bound, bound)
        b = jax.random.uniform(kb, (1, fan_out), jnp.float32, -bound, bound)
        params.append((w, b))
    return params


def reference_forward(x, params):
    h = x
    for i, (w, b) in enumerate(params):
        h = h @ w + b
        if i < len(params) - 1:
            h = jnp.maximum(h, 0.0)
    return jax.nn.softmax(h, axis=1)


if __name__ == "__main__":
    key = jax.random.PRNGKey(0)
    kx, kp = jax.random.split(key)
    B = 8
    x = jax.random.normal(kx, (B, INPUT_DIM), jnp.float32)
    params = init_params(kp)

    out = jax.block_until_ready(nn_forward(x, params))
    ref = reference_forward(x, params)

    assert out.shape == (B, OUTPUT_DIM)
    assert bool(jnp.all(jnp.isfinite(out)))
    assert jnp.allclose(jnp.sum(out, axis=1), 1.0, atol=1e-2)
    # bf16 matmul operands + approx reciprocal -> loosened tolerance vs f32 reference
    assert jnp.allclose(out, ref, atol=2e-2, rtol=0.0), "mismatch vs reference"
    print("KERNEL_OK")
</pallas_src>

<mosaic_0001>
module attributes {stable_mosaic.version = 11 : i64} {
  func.func @mlp_kernel(%arg0: i32, %arg1: memref<8x64xbf16, #tpu.memory_space<vmem>>, %arg2: memref<64x64xbf16, #tpu.memory_space<vmem>>, %arg3: memref<1x64xf32, #tpu.memory_space<vmem>>, %arg4: memref<64x32xbf16, #tpu.memory_space<vmem>>, %arg5: memref<1x32xf32, #tpu.memory_space<vmem>>, %arg6: memref<32x16xbf16, #tpu.memory_space<vmem>>, %arg7: memref<1x16xf32, #tpu.memory_space<vmem>>, %arg8: memref<16x128xbf16, #tpu.memory_space<vmem>>, %arg9: memref<1x128xf32, #tpu.memory_space<vmem>>, %arg10: memref<8x128xf32, #tpu.memory_space<vmem>>) attributes {dimension_semantics = [#tpu.dimension_semantics<parallel>], iteration_bounds = array<i64: 1>, scalar_prefetch = 0 : i64, scratch_operands = 0 : i64, tpu.core_type = #tpu.core_type<tc>, window_params = [{transform_indices = @transform_0, window_bounds = array<i64: 8, 64>}, {pipeline_mode = #tpu.pipeline_mode<synchronous>, transform_indices = @transform_1, window_bounds = array<i64: 64, 64>}, {pipeline_mode = #tpu.pipeline_mode<synchronous>, transform_indices = @transform_2, window_bounds = array<i64: 1, 64>}, {pipeline_mode = #tpu.pipeline_mode<synchronous>, transform_indices = @transform_3, window_bounds = array<i64: 64, 32>}, {pipeline_mode = #tpu.pipeline_mode<synchronous>, transform_indices = @transform_4, window_bounds = array<i64: 1, 32>}, {pipeline_mode = #tpu.pipeline_mode<synchronous>, transform_indices = @transform_5, window_bounds = array<i64: 32, 16>}, {pipeline_mode = #tpu.pipeline_mode<synchronous>, transform_indices = @transform_6, window_bounds = array<i64: 1, 16>}, {pipeline_mode = #tpu.pipeline_mode<synchronous>, transform_indices = @transform_7, window_bounds = array<i64: 16, 128>}, {pipeline_mode = #tpu.pipeline_mode<synchronous>, transform_indices = @transform_8, window_bounds = array<i64: 1, 128>}, {transform_indices = @transform_9, window_bounds = array<i64: 8, 128>}]} {
    %c0 = arith.constant 0 : index
    %c0_0 = arith.constant 0 : index
    %0 = vector.load %arg1[%c0, %c0_0] : memref<8x64xbf16, #tpu.memory_space<vmem>>, vector<8x64xbf16>
    %c0_1 = arith.constant 0 : index
    %c0_2 = arith.constant 0 : index
    %1 = vector.load %arg2[%c0_1, %c0_2] : memref<64x64xbf16, #tpu.memory_space<vmem>>, vector<64x64xbf16>
    %cst = arith.constant dense<0.000000e+00> : vector<8x64xf32>
    %2 = tpu.matmul %0, %1, %cst {dimension_numbers = #tpu.dot_dimension_numbers<[1], [0], [0], [1], [0, 0, 1, 1], [], []>} : vector<8x64xbf16>, vector<64x64xbf16>, vector<8x64xf32> -> vector<8x64xf32>
    %c0_3 = arith.constant 0 : index
    %c0_4 = arith.constant 0 : index
    %3 = vector.load %arg3[%c0_3, %c0_4] : memref<1x64xf32, #tpu.memory_space<vmem>>, vector<1x64xf32>
    %4 = vector.broadcast %3 : vector<1x64xf32> to vector<8x64xf32>
    %5 = arith.addf %2, %4 : vector<8x64xf32>
    %cst_5 = arith.constant 0.000000e+00 : f32
    %6 = vector.broadcast %cst_5 : f32 to vector<8x64xf32>
    %7 = arith.maximumf %5, %6 : vector<8x64xf32>
    %8 = arith.truncf %7 : vector<8x64xf32> to vector<8x64xbf16>
    %c0_6 = arith.constant 0 : index
    %c0_7 = arith.constant 0 : index
    %9 = vector.load %arg4[%c0_6, %c0_7] : memref<64x32xbf16, #tpu.memory_space<vmem>>, vector<64x32xbf16>
    %cst_8 = arith.constant dense<0.000000e+00> : vector<8x32xf32>
    %10 = tpu.matmul %8, %9, %cst_8 {dimension_numbers = #tpu.dot_dimension_numbers<[1], [0], [0], [1], [0, 0, 1, 1], [], []>} : vector<8x64xbf16>, vector<64x32xbf16>, vector<8x32xf32> -> vector<8x32xf32>
    %c0_9 = arith.constant 0 : index
    %c0_10 = arith.constant 0 : index
    %11 = vector.load %arg5[%c0_9, %c0_10] : memref<1x32xf32, #tpu.memory_space<vmem>>, vector<1x32xf32>
    %12 = vector.broadcast %11 : vector<1x32xf32> to vector<8x32xf32>
    %13 = arith.addf %10, %12 : vector<8x32xf32>
    %cst_11 = arith.constant 0.000000e+00 : f32
    %14 = vector.broadcast %cst_11 : f32 to vector<8x32xf32>
    %15 = arith.maximumf %13, %14 : vector<8x32xf32>
    %16 = arith.truncf %15 : vector<8x32xf32> to vector<8x32xbf16>
    %c0_12 = arith.constant 0 : index
    %c0_13 = arith.constant 0 : index
    %17 = vector.load %arg6[%c0_12, %c0_13] : memref<32x16xbf16, #tpu.memory_space<vmem>>, vector<32x16xbf16>
    %cst_14 = arith.constant dense<0.000000e+00> : vector<8x16xf32>
    %18 = tpu.matmul %16, %17, %cst_14 {dimension_numbers = #tpu.dot_dimension_numbers<[1], [0], [0], [1], [0, 0, 1, 1], [], []>} : vector<8x32xbf16>, vector<32x16xbf16>, vector<8x16xf32> -> vector<8x16xf32>
    %c0_15 = arith.constant 0 : index
    %c0_16 = arith.constant 0 : index
    %19 = vector.load %arg7[%c0_15, %c0_16] : memref<1x16xf32, #tpu.memory_space<vmem>>, vector<1x16xf32>
    %20 = vector.broadcast %19 : vector<1x16xf32> to vector<8x16xf32>
    %21 = arith.addf %18, %20 : vector<8x16xf32>
    %cst_17 = arith.constant 0.000000e+00 : f32
    %22 = vector.broadcast %cst_17 : f32 to vector<8x16xf32>
    %23 = arith.maximumf %21, %22 : vector<8x16xf32>
    %24 = arith.truncf %23 : vector<8x16xf32> to vector<8x16xbf16>
    %c0_18 = arith.constant 0 : index
    %c0_19 = arith.constant 0 : index
    %25 = vector.load %arg8[%c0_18, %c0_19] : memref<16x128xbf16, #tpu.memory_space<vmem>>, vector<16x128xbf16>
    %cst_20 = arith.constant dense<0.000000e+00> : vector<8x128xf32>
    %26 = tpu.matmul %24, %25, %cst_20 {dimension_numbers = #tpu.dot_dimension_numbers<[1], [0], [0], [1], [0, 0, 1, 1], [], []>} : vector<8x16xbf16>, vector<16x128xbf16>, vector<8x128xf32> -> vector<8x128xf32>
    %c0_21 = arith.constant 0 : index
    %c0_22 = arith.constant 0 : index
    %27 = vector.load %arg9[%c0_21, %c0_22] : memref<1x128xf32, #tpu.memory_space<vmem>>, vector<1x128xf32>
    %28 = vector.broadcast %27 : vector<1x128xf32> to vector<8x128xf32>
    %29 = arith.addf %26, %28 : vector<8x128xf32>
    %cst_23 = arith.constant dense<0xFF800000> : vector<8xf32>
    %30 = vector.multi_reduction <maximumf>, %29, %cst_23 [1] : vector<8x128xf32> to vector<8xf32>
    %31 = vector.shape_cast %30 : vector<8xf32> to vector<8x1xf32>
    %32 = vector.broadcast %31 : vector<8x1xf32> to vector<8x128xf32>
    %33 = arith.subf %29, %32 : vector<8x128xf32>
    %34 = math.exp %33 : vector<8x128xf32>
    %cst_24 = arith.constant dense<0.000000e+00> : vector<8xf32>
    %35 = vector.multi_reduction <add>, %34, %cst_24 [1] : vector<8x128xf32> to vector<8xf32>
    %36 = vector.shape_cast %35 : vector<8xf32> to vector<8x1xf32>
    %37 = tpu.reciprocal %36 {approx = true} : vector<8x1xf32> -> vector<8x1xf32>
    %38 = vector.broadcast %37 : vector<8x1xf32> to vector<8x128xf32>
    %39 = arith.mulf %34, %38 : vector<8x128xf32>
    %c0_25 = arith.constant 0 : index
    %c0_26 = arith.constant 0 : index
    %40 = vector.load %arg10[%c0_25, %c0_26] : memref<8x128xf32, #tpu.memory_space<vmem>>, vector<8x128xf32>
    tpu.vector_store %arg10[%c0_25, %c0_26], %39 {strides = array<i32>} : memref<8x128xf32, #tpu.memory_space<vmem>>, vector<8x128xf32>,
    return
  }
  func.func @transform_0(%arg0: i32) -> (i32, i32) {
    %c0_i32 = arith.constant 0 : i32
    %c0_i32_0 = arith.constant 0 : i32
    return %arg0, %c0_i32 : i32, i32
  }
  func.func @transform_1(%arg0: i32) -> (i32, i32) {
    %c0_i32 = arith.constant 0 : i32
    %c0_i32_0 = arith.constant 0 : i32
    %c0_i32_1 = arith.constant 0 : i32
    return %c0_i32, %c0_i32_0 : i32, i32
  }
  func.func @transform_2(%arg0: i32) -> (i32, i32) {
    %c0_i32 = arith.constant 0 : i32
    %c0_i32_0 = arith.constant 0 : i32
    %c0_i32_1 = arith.constant 0 : i32
    return %c0_i32, %c0_i32_0 : i32, i32
  }
  func.func @transform_3(%arg0: i32) -> (i32, i32) {
    %c0_i32 = arith.constant 0 : i32
    %c0_i32_0 = arith.constant 0 : i32
    %c0_i32_1 = arith.constant 0 : i32
    return %c0_i32, %c0_i32_0 : i32, i32
  }
  func.func @transform_4(%arg0: i32) -> (i32, i32) {
    %c0_i32 = arith.constant 0 : i32
    %c0_i32_0 = arith.constant 0 : i32
    %c0_i32_1 = arith.constant 0 : i32
    return %c0_i32, %c0_i32_0 : i32, i32
  }
  func.func @transform_5(%arg0: i32) -> (i32, i32) {
    %c0_i32 = arith.constant 0 : i32
    %c0_i32_0 = arith.constant 0 : i32
    %c0_i32_1 = arith.constant 0 : i32
    return %c0_i32, %c0_i32_0 : i32, i32
  }
  func.func @transform_6(%arg0: i32) -> (i32, i32) {
    %c0_i32 = arith.constant 0 : i32
    %c0_i32_0 = arith.constant 0 : i32
    %c0_i32_1 = arith.constant 0 : i32
    return %c0_i32, %c0_i32_0 : i32, i32
  }
  func.func @transform_7(%arg0: i32) -> (i32, i32) {
    %c0_i32 = arith.constant 0 : i32
    %c0_i32_0 = arith.constant 0 : i32
    %c0_i32_1 = arith.constant 0 : i32
    return %c0_i32, %c0_i32_0 : i32, i32
  }
  func.func @transform_8(%arg0: i32) -> (i32, i32) {
    %c0_i32 = arith.constant 0 : i32
    %c0_i32_0 = arith.constant 0 : i32
    %c0_i32_1 = arith.constant 0 : i32
    return %c0_i32, %c0_i32_0 : i32, i32
  }
  func.func @transform_9(%arg0: i32) -> (i32, i32) {
    %c0_i32 = arith.constant 0 : i32
    %c0_i32_0 = arith.constant 0 : i32
    return %arg0, %c0_i32 : i32, i32
  }
}

</mosaic_0001>

<bundles_post_ra>
// kernel: tpu_custom_call.1
= control target key start
LH: loop header
LB: loop body
LE: loop exit
PB: predicated region body
PF: predicated region fallthrough
CT: control target
= control target key end

     0   :  { %v470_v1 = vmov 0.0   ;;  %vm471_vm0 = vmmov 0   ;;  %s589_s0 = inlined_call_operand.vmem [shape: bf16[8,64], index: 0, kind: input, shape index: {}]   ;;  %s590_s1 = inlined_call_operand.vmem [shape: bf16[64,64], index: 1, kind: input, shape index: {}]   ;;  %s591_s2 = inlined_call_operand.vmem [shape: f32[1,64], index: 2, kind: input, shape index: {}]   ;;  %s592_s3 = inlined_call_operand.vmem [shape: bf16[64,32], index: 3, kind: input, shape index: {}]   ;;  %s593_s4 = inlined_call_operand.vmem [shape: f32[1,32], index: 4, kind: input, shape index: {}]   ;;  %s594_s5 = inlined_call_operand.vmem [shape: bf16[32,16], index: 5, kind: input, shape index: {}]   ;;  %s595_s6 = inlined_call_operand.vmem [shape: f32[1,16], index: 6, kind: input, shape index: {}]   ;;  %s596_s7 = inlined_call_operand.vmem [shape: bf16[16,128], index: 7, kind: input, shape index: {}]   ;;  %s597_s8 = inlined_call_operand.vmem [shape: f32[1,128], index: 8, kind: input, shape index: {}]   ;;  %s598_s9 = inlined_call_operand.hbm [shape: f32[8,128], index: 9, kind: output, shape index: {}]  }
   0x1   :  { %v431_v0 = vld [vmem:[%s590_s1] sm:$0xff]   ;;  %390 = vmatprep.subr.bf16.mxu0 %v470_v1  ;;  %402 = vmatprep.subr.bf16.mxu1 %v470_v1  ;;  %v432_v2 = vld [vmem:[%s590_s1 + $0x8] sm:$0xff]   ;;  %v433_v4 = vld [vmem:[%s590_s1 + $0x10] sm:$0xff]  }
   0x2   :  { %391 = vmatpush3.bf16.msra.mxu0 %v431_v0  ;;  %398 = vmatprep.mubr.msk.bf16.mxu0 %vm471_vm0, %v470_v1  ;;  %v435_v3 = vld [vmem:[%s592_s3] sm:$0xff]   ;;  %v436_v5 = vld [vmem:[%s592_s3 + $0x8] sm:$0xff]   ;;  %v434_v6 = vld [vmem:[%s590_s1 + $0x18] sm:$0xff]  }
   0x3   :  { %392 = vmatprep.subr.bf16.mxu0 %v470_v1  ;;  %410 = vmatprep.mubr.msk.bf16.mxu1 %vm471_vm0, %v470_v1 }
   0x4   :  { %403 = vmatpush3.bf16.msra.mxu1 %v435_v3 }
   0x5   :  { %404 = vmatprep.subr.bf16.mxu1 %v470_v1 }
   0x6   :  { %393 = vmatpush3.bf16.msra.mxu0 %v432_v2 }
   0x7   :  { %394 = vmatprep.subr.bf16.mxu0 %v470_v1 }
   0xa   :  { %395 = vmatpush3.bf16.msra.mxu0 %v433_v4 }
   0xb   :  { %14 = vsyncpa [#allocation3], 0  ;;  %396 = vmatprep.subr.bf16.mxu0 %v470_v1  ;;  %405 = vmatpush3.bf16.msra.mxu1 %v436_v5  ;;  %v34_v7 = vld [vmem:[%s589_s0] sm:$0xf]  ;;  %vm74_vm1 = vcmask 523264   ;;  %v437_v8 = vld [vmem:[%s592_s3 + $0x10] sm:$0xff]  }
   0xc   :  { %406 = vmatprep.subr.bf16.mxu1 %v470_v1  ;;  %v438_v9 = vld [vmem:[%s592_s3 + $0x18] sm:$0xff]   ;;  %v439_v10 = vld [vmem:[%s594_s5] sm:$0xff]   ;;  %v440_v19 = vld [vmem:[%s594_s5 + $0x8] sm:$0xff]   ;;  %vm227_vm2 = vcmask 261120   ;;  %vm288_vm3 = vcmask 130048  }
   0xd   :  { %v356_v11 = vld [vmem:[%s591_s2] ss:$0 sm:$0xff] }
   0xe   :  { %397 = vmatpush3.bf16.msra.mxu0 %v434_v6  ;;  %v441_v20 = vld [vmem:[%s596_s7] sm:$0xff]  }
   0xf   :  { %414 = vmatprep.subr.bf16.mxu0 %v470_v1  ;;  %407 = vmatpush3.bf16.msra.mxu1 %v437_v8  ;;  %v362_v21 = vld [vmem:[%s593_s4] ss:$0 sm:$0xff] }
  0x10   :  { %408 = vmatprep.subr.bf16.mxu1 %v470_v1  ;;  %v368_v29 = vld [vmem:[%s595_s6] ss:$0 sm:$0xff]  ;;  %s472_s6 = smov [#allocation2]  }
  0x11   :  { %399 = vmatmul.mubr.msk.bf16.vlgmr.msra.gmra.mrb[0].mxu0 %vm74_vm1, %v34_v7  ;;  %v372_v37 = vld [vmem:[%s597_s8] ss:$0 sm:$0xff]  ;;  %s348_s13 = sshll.u32 %s472_s6, 4  ;;  %s349_s13 = int_to_ptr.vmem [resolvable:$true] %s348_s13 }
  0x12   :  { %418 = vmatprep.mubr.msk.bf16.mxu0 %vm471_vm0, %v470_v1  ;;  %415 = vmatpush3.bf16.msra.mxu0 %v439_v10  ;;  %s446_s8 = scalar_lea.vmem %s349_s13, 128  ;;  %p451_p1 = scmp.lt.s32.totalorder %s349_s13, %s349_s13 }
  0x13   :  { %409 = vmatpush3.bf16.msra.mxu1 %v438_v9  ;;  %416 = vmatprep.subr.bf16.mxu0 %v470_v1  ;;  %p447_p0 = scmp.ne.s32.totalorder %s349_s13, %s446_s8  ;;  %p452_p2 = scmp.lt.s32.totalorder %s446_s8, %s446_s8 }
  0x14   :  { %422 = vmatprep.subr.bf16.mxu1 %v470_v1 }
  0x15   :  { %p453_p3 = por %p452_p2, %p451_p1 }
  0x16   :  { %417 = vmatpush3.bf16.msra.mxu0 %v440_v19 }
  0x17   :  { %p454_p4 = pnand %p453_p3, %p447_p0 }
  0xe4   :  { %v112_v12 = vpop.f32.mrb[0].mxu0 }
  0xe5   :  { %v113_v13 = vadd.f32 %v356_v11, %v112_v12  ;;  %v400_v14 = vpop.f32.mrb[1].mxu0 }
  0xe6   :  { %v115_v15 = vpop.f32.mrb[2].mxu0 }
  0xe7   :  { %v118_v16 = vmax.f32 %v113_v13, 0.0  ;;  %v401_v17 = vpop.f32.mrb[3].mxu0 }
  0xe9   :  { %v119_v18 = vpack.c.bf16 %v118_v16, %v118_v16 }
  0xeb   :  { %411 = vmatmul.mubr.msk.bf16.vlgmr.msra.gmra.mrb[0].mxu1 %vm74_vm1, %v119_v18 }
  0xec   :  { %424 = vmatprep.mubr.msk.bf16.mxu1 %vm471_vm0, %v470_v1  ;;  %423 = vmatpush3.bf16.msra.mxu1 %v441_v20 }
 0x1be   :  { %v196_v22 = vpop.f32.mrb[0].mxu1 }
 0x1bf   :  { %v197_v23 = vadd.f32 %v362_v21, %v196_v22  ;;  %v412_v24 = vpop.f32.mrb[1].mxu1 }
 0x1c0   :  { %v199_v25 = vpop.f32.mrb[2].mxu1 }
 0x1c1   :  { %v202_v26 = vmax.f32 %v197_v23, 0.0  ;;  %v413_v27 = vpop.f32.mrb[3].mxu1 }
 0x1c3   :  { %v203_v28 = vpack.c.bf16 %v202_v26, %v202_v26 }
 0x1c5   :  { %419 = vmatmul.mubr.msk.bf16.vlgmr.msra.gmra.mrb[4].mxu0 %vm227_vm2, %v203_v28 }
 0x298   :  { %v265_v30 = vpop.f32.mrb[4].mxu0 }
 0x299   :  { %v266_v31 = vadd.f32 %v368_v29, %v265_v30  ;;  %v420_v32 = vpop.f32.mrb[5].mxu0 }
 0x29a   :  { %v268_v33 = vpop.f32.mrb[6].mxu0 }
 0x29b   :  { %v271_v34 = vmax.f32 %v266_v31, 0.0  ;;  %v421_v35 = vpop.f32.mrb[7].mxu0 }
 0x29d   :  { %v272_v36 = vpack.c.bf16 %v271_v34, %v271_v34 }
 0x29f   :  { %425 = vmatmul.mubr.msk.bf16.vlgmr.msra.gmra.mrb[4].mxu1 %vm288_vm3, %v272_v36 }
 0x372   :  { %v326_v38 = vpop.f32.mrb[4].mxu1 }
 0x373   :  { %v327_v39 = vadd.f32 %v372_v37, %v326_v38  ;;  %v426_v40 = vpop.f32.mrb[5].mxu1 }
 0x374   :  { %v329_v41 = vpop.f32.mrb[6].mxu1 }
 0x375   :  { %332 = vmax.xlane.f32.xlu0 %v327_v39  ;;  %v427_v42 = vpop.f32.mrb[7].mxu1 }
 0x402   :  { %v333_v43 = vpop.xlane.xlu0 %332 }
 0x403   :  { %v334_v44 = vsub.f32 %v327_v39, %v333_v43 }
 0x405   :  { %v335_v45 = vmul.f32 1.442695, %v334_v44 }
 0x407   :  { %442 = vpow2.f32 %v335_v45 }
 0x411   :  { %v443_v46 = vpop.eup %442 }
 0x412   :  { %337 = vadd.xlane.f32.xlu0 %v443_v46 }
 0x49f   :  { %v338_v47 = vpop.xlane.xlu0 %337 }
 0x4a0   :  { %444 = vrcp.f32 %v338_v47 }
 0x4aa   :  { %v445_v48 = vpop.eup %444 }
 0x4ab   :  { %v340_v49 = vmul.f32 %v445_v48, %v443_v46 }
 0x4ad   :  { %341 = vst [vmem:[#allocation2] sm:$0xff] %v340_v49 }
 0x4ae   :  { %457 = shalt.err (!%p454_p4)
}
 0x4af   :  { %s458_s16 = scalar_lea.hbm %s598_s9, 128 }
 0x4b0   :  { %p459_p5 = scmp.ne.s32.totalorder %s598_s9, %s458_s16  ;;  %p462_p6 = scmp.lt.u32.totalorder %s458_s16, %s598_s9 }
 0x4b2   :  { %p464_p7 = pnand %p462_p6, %p459_p5 }
 0x4b4   :  { %467 = shalt.err (!%p464_p7)
}
 0x4b5   :  { %351 = dma.vmem_to_hbm [thread:$0]  %s349_s13, 128, %s598_s9, [#allocation3]  }
 0x4b6   :  { %468 = dma.done.wait [#allocation3], 128  }
 0x4b7   :  { %469 = vsyncadd [#allocation3], 4294967168 }
 0x4b8   :  { %355 = vsyncpa [#allocation3], 1 }

</bundles_post_ra>
